<compile_context>
chip_gen: v7x
topology: tpu7x:2x2x1
jax: 0.10.0
libtpu: 0.0.40
codegen_flags: <defaults>
</compile_context>

<pallas_src>
import functools

import jax
import jax.numpy as jnp
from jax import lax
from jax.experimental import pallas as pl
from jax.experimental.pallas import tpu as pltpu


def _residual_kernel(xflat_ref, w1_ref, w2_ref, out_ref, *, N, H, W, Cin, Cout):
    # xflat_ref : (N, Cin, Lp)   H-padded, flattened, front-padded activation
    # w1_ref    : (Cout, 9*Cin)  conv3x3 weights, tap-major along K
    # w2_ref    : (Cout, Cout)   conv1x1 weights, (out, in)
    # out_ref   : (N, Cout, H*W)
    HW = H * W
    w1 = w1_ref[...]                      # (Cout, 9*Cin)  -- used whole, no lane slicing
    w2 = w2_ref[...]                      # (Cout, Cout)

    # Column index of every flattened spatial position, shape (1, HW);
    # broadcasting inside jnp.where handles the channel dimension.
    col = lax.broadcasted_iota(jnp.int32, (1, HW), 1) % W
    left_edge = col == 0                  # x == 0     -> tap column -1 is pad
    right_edge = col == W - 1             # x == W - 1 -> tap column W  is pad

    # Statically unrolled batch loop: whole batch handled in one grid step
    # (toy shape is pipeline-step-overhead bound; prologue is paid once).
    for n in range(N):
        xb = xflat_ref[n]                 # (Cin, Lp)

        taps = []
        res = None
        # 3x3 "same" conv: 9 constant lane-shift windows of the flat buffer,
        # stacked along sublanes into a single im2col RHS.
        for dy in range(3):
            for dx in range(3):
                s = dy * W + dx                                  # constant shift
                patch = xb[:, s:s + HW].astype(jnp.float32)      # (Cin, HW)
                if dy == 1 and dx == 1:
                    res = patch           # centre tap == unpadded input (residual)
                if dx == 0:
                    patch = jnp.where(left_edge, 0.0, patch)
                elif dx == 2:
                    patch = jnp.where(right_edge, 0.0, patch)
                taps.append(patch)

        patches = jnp.concatenate(taps, axis=0)                  # (9*Cin, HW)

        # Single fat-K MXU matmul (K = 9*Cin) instead of 9 thin ones.
        acc = jnp.dot(w1, patches, preferred_element_type=jnp.float32)  # (Cout, HW)
        h = jnp.maximum(acc, 0.0)                                # ReLU (f32, VPU)
        y = jnp.dot(w2, h, preferred_element_type=jnp.float32)   # conv1x1

        out_ref[n] = (res + y).astype(out_ref.dtype)             # lane-dense store


def residual_layer(x_nchw, w1_hwio, w2_io):
    """x_nchw: (N, Cin, H, W); w1_hwio: (3,3,Cin,Cout); w2_io: (Cin_mid, Cout)."""
    N, Cin, H, W = x_nchw.shape
    Cout = w1_hwio.shape[-1]
    assert Cin == Cout, "residual add requires in_channels == out_channels"

    HW = H * W
    L0 = (H + 2) * W                       # H-padded, flattened spatial length
    Lp = ((L0 + 2 + 127) // 128) * 128     # +1 front pad, >= max tap window, lane multiple

    # Wrapper glue (no transposes): pad H by 1 each side, flatten spatial,
    # front-pad the flat axis by 1 and round up to a lane multiple.
    a = jnp.pad(x_nchw, ((0, 0), (0, 0), (1, 1), (0, 0)))          # (N,C,H+2,W)
    xflat = jnp.pad(a.reshape(N, Cin, L0),
                    ((0, 0), (0, 0), (1, Lp - L0 - 1)))            # (N,C,Lp)

    # conv3x3 weights -> single (Cout, 9*Cin) tile, tap-major along K, matching
    # the im2col stacking order inside the kernel:
    #   w1t[o, (dy*3+dx)*Cin + c] = w1_hwio[dy, dx, c, o]
    w1t = jnp.transpose(w1_hwio, (3, 0, 1, 2)).reshape(Cout, 9 * Cin)
    # conv1x1 weights (I, O) -> (O, I) so they can be the matmul LHS.
    w2t = jnp.transpose(w2_io, (1, 0))

    kernel = functools.partial(_residual_kernel, N=N, H=H, W=W, Cin=Cin, Cout=Cout)

    out_flat = pl.pallas_call(
        kernel,
        out_shape=jax.ShapeDtypeStruct((N, Cout, HW), x_nchw.dtype),
        grid_spec=pltpu.PrefetchScalarGridSpec(
            num_scalar_prefetch=0,
            grid=(1,),                                   # whole batch in one step
            in_specs=[
                pl.BlockSpec((N, Cin, Lp), lambda i: (0, 0, 0)),
                pl.BlockSpec((Cout, 9 * Cin), lambda i: (0, 0)),
                pl.BlockSpec((Cout, Cout), lambda i: (0, 0)),
            ],
            out_specs=pl.BlockSpec((N, Cout, HW), lambda i: (0, 0, 0)),
        ),
        compiler_params=pltpu.CompilerParams(
            dimension_semantics=("arbitrary",)
        ),
    )(xflat, w1t, w2t)

    # Free, contiguous reshape back to NCHW.
    return out_flat.reshape(N, Cout, H, W)


def _reference(x_nchw, w1_hwio, w2_io):
    # Pure-JAX reference using lax.conv (NCHW, OIHW) for correctness check.
    w1_oihw = jnp.transpose(w1_hwio, (3, 2, 0, 1))                  # (O, I, 3, 3)
    w2_oihw = jnp.transpose(w2_io, (1, 0))[:, :, None, None]        # (O, I, 1, 1)
    h = lax.conv_general_dilated(
        x_nchw, w1_oihw, window_strides=(1, 1), padding="SAME",
        dimension_numbers=("NCHW", "OIHW", "NCHW"))
    h = jnp.maximum(h, 0.0)
    y = lax.conv_general_dilated(
        h, w2_oihw, window_strides=(1, 1), padding="VALID",
        dimension_numbers=("NCHW", "OIHW", "NCHW"))
    return x_nchw + y


if __name__ == "__main__":
    # Small shapes consistent with the module: batch=2, channels=4, spatial=16.
    N, C, H, W = 2, 4, 16, 16

    key = jax.random.PRNGKey(0)
    kx, kw1, kw2 = jax.random.split(key, 3)

    x = jax.random.normal(kx, (N, C, H, W), dtype=jnp.float32)
    # Deterministic synthetic weights (Conv2d, bias=False):
    #   conv3x3 stored HWIO (3,3,Cin,Cout); conv1x1 stored (Cin, Cout).
    w1 = jax.random.normal(kw1, (3, 3, C, C), dtype=jnp.float32) * 0.1
    w2 = jax.random.normal(kw2, (C, C), dtype=jnp.float32) * 0.1

    out = residual_layer(x, w1, w2)
    out = jax.block_until_ready(out)

    ref = _reference(x, w1, w2)
    assert out.shape == (N, C, H, W)
    assert jnp.allclose(out, ref, atol=1e-4, rtol=1e-4), "mismatch vs reference"

    print("KERNEL_OK")
</pallas_src>

<mosaic_0001>
module attributes {stable_mosaic.version = 11 : i64} {
  func.func @_residual_kernel(%arg0: i32, %arg1: memref<2x4x384xf32, #tpu.memory_space<vmem>>, %arg2: memref<4x36xf32, #tpu.memory_space<vmem>>, %arg3: memref<4x4xf32, #tpu.memory_space<vmem>>, %arg4: memref<2x4x256xf32, #tpu.memory_space<vmem>>) attributes {dimension_semantics = [#tpu.dimension_semantics<arbitrary>], iteration_bounds = array<i64: 1>, scalar_prefetch = 0 : i64, scratch_operands = 0 : i64, tpu.core_type = #tpu.core_type<tc>, window_params = [{pipeline_mode = #tpu.pipeline_mode<synchronous>, transform_indices = @transform_0, window_bounds = array<i64: 2, 4, 384>}, {pipeline_mode = #tpu.pipeline_mode<synchronous>, transform_indices = @transform_1, window_bounds = array<i64: 4, 36>}, {pipeline_mode = #tpu.pipeline_mode<synchronous>, transform_indices = @transform_2, window_bounds = array<i64: 4, 4>}, {pipeline_mode = #tpu.pipeline_mode<synchronous>, transform_indices = @transform_3, window_bounds = array<i64: 2, 4, 256>}]} {
    %c0 = arith.constant 0 : index
    %c0_0 = arith.constant 0 : index
    %0 = vector.load %arg2[%c0, %c0_0] : memref<4x36xf32, #tpu.memory_space<vmem>>, vector<4x36xf32>
    %c0_1 = arith.constant 0 : index
    %c0_2 = arith.constant 0 : index
    %1 = vector.load %arg3[%c0_1, %c0_2] : memref<4x4xf32, #tpu.memory_space<vmem>>, vector<4x4xf32>
    %2 = tpu.iota {dimensions = array<i32: 1>} : vector<1x256xi32>
    %c16_i32 = arith.constant 16 : i32
    %c0_i32 = arith.constant 0 : i32
    %3 = arith.cmpi eq, %c16_i32, %c0_i32 : i32
    %c1_i32 = arith.constant 1 : i32
    %4 = arith.select %3, %c1_i32, %c16_i32 : i32
    %5 = vector.broadcast %4 : i32 to vector<1x256xi32>
    %6 = arith.remsi %2, %5 : vector<1x256xi32>
    %c0_i32_3 = arith.constant 0 : i32
    %7 = vector.broadcast %c0_i32_3 : i32 to vector<1x256xi32>
    %8 = arith.cmpi ne, %6, %7 : vector<1x256xi32>
    %c0_i32_4 = arith.constant 0 : i32
    %9 = vector.broadcast %c0_i32_4 : i32 to vector<1x256xi32>
    %10 = arith.cmpi slt, %6, %9 : vector<1x256xi32>
    %c0_i32_5 = arith.constant 0 : i32
    %11 = arith.cmpi slt, %4, %c0_i32_5 : i32
    %12 = vector.broadcast %11 : i1 to vector<1x256xi1>
    %13 = vector.broadcast %12 : vector<1x256xi1> to vector<1x256xi1>
    %14 = arith.xori %10, %13 : vector<1x256xi1>
    %15 = arith.andi %14, %8 : vector<1x256xi1>
    %16 = vector.broadcast %4 : i32 to vector<1x256xi32>
    %17 = arith.addi %6, %16 : vector<1x256xi32>
    %18 = arith.select %15, %17, %6 : vector<1x256xi1>, vector<1x256xi32>
    %c0_i32_6 = arith.constant 0 : i32
    %19 = vector.broadcast %c0_i32_6 : i32 to vector<1x256xi32>
    %20 = arith.cmpi eq, %18, %19 : vector<1x256xi32>
    %c15_i32 = arith.constant 15 : i32
    %21 = vector.broadcast %c15_i32 : i32 to vector<1x256xi32>
    %22 = arith.cmpi eq, %18, %21 : vector<1x256xi32>
    %c0_7 = arith.constant 0 : index
    %c0_8 = arith.constant 0 : index
    %c0_9 = arith.constant 0 : index
    %23 = vector.load %arg1[%c0_7, %c0_8, %c0_9] : memref<2x4x384xf32, #tpu.memory_space<vmem>>, vector<1x4x384xf32>
    %24 = vector.shape_cast %23 : vector<1x4x384xf32> to vector<4x384xf32>
    %25 = vector.extract_strided_slice %24 {offsets = [0, 0], sizes = [4, 256], strides = [1, 1]} : vector<4x384xf32> to vector<4x256xf32>
    %cst = arith.constant 0.000000e+00 : f32
    %26 = vector.shape_cast %20 : vector<1x256xi1> to vector<1x256xi1>
    %27 = vector.broadcast %26 : vector<1x256xi1> to vector<4x256xi1>
    %28 = vector.broadcast %cst : f32 to vector<4x256xf32>
    %29 = arith.select %27, %28, %25 : vector<4x256xi1>, vector<4x256xf32>
    %30 = vector.extract_strided_slice %24 {offsets = [0, 1], sizes = [4, 256], strides = [1, 1]} : vector<4x384xf32> to vector<4x256xf32>
    %31 = vector.extract_strided_slice %24 {offsets = [0, 2], sizes = [4, 256], strides = [1, 1]} : vector<4x384xf32> to vector<4x256xf32>
    %cst_10 = arith.constant 0.000000e+00 : f32
    %32 = vector.shape_cast %22 : vector<1x256xi1> to vector<1x256xi1>
    %33 = vector.broadcast %32 : vector<1x256xi1> to vector<4x256xi1>
    %34 = vector.broadcast %cst_10 : f32 to vector<4x256xf32>
    %35 = arith.select %33, %34, %31 : vector<4x256xi1>, vector<4x256xf32>
    %36 = vector.extract_strided_slice %24 {offsets = [0, 16], sizes = [4, 256], strides = [1, 1]} : vector<4x384xf32> to vector<4x256xf32>
    %cst_11 = arith.constant 0.000000e+00 : f32
    %37 = vector.shape_cast %20 : vector<1x256xi1> to vector<1x256xi1>
    %38 = vector.broadcast %37 : vector<1x256xi1> to vector<4x256xi1>
    %39 = vector.broadcast %cst_11 : f32 to vector<4x256xf32>
    %40 = arith.select %38, %39, %36 : vector<4x256xi1>, vector<4x256xf32>
    %41 = vector.extract_strided_slice %24 {offsets = [0, 17], sizes = [4, 256], strides = [1, 1]} : vector<4x384xf32> to vector<4x256xf32>
    %42 = vector.extract_strided_slice %24 {offsets = [0, 18], sizes = [4, 256], strides = [1, 1]} : vector<4x384xf32> to vector<4x256xf32>
    %cst_12 = arith.constant 0.000000e+00 : f32
    %43 = vector.shape_cast %22 : vector<1x256xi1> to vector<1x256xi1>
    %44 = vector.broadcast %43 : vector<1x256xi1> to vector<4x256xi1>
    %45 = vector.broadcast %cst_12 : f32 to vector<4x256xf32>
    %46 = arith.select %44, %45, %42 : vector<4x256xi1>, vector<4x256xf32>
    %47 = vector.extract_strided_slice %24 {offsets = [0, 32], sizes = [4, 256], strides = [1, 1]} : vector<4x384xf32> to vector<4x256xf32>
    %cst_13 = arith.constant 0.000000e+00 : f32
    %48 = vector.shape_cast %20 : vector<1x256xi1> to vector<1x256xi1>
    %49 = vector.broadcast %48 : vector<1x256xi1> to vector<4x256xi1>
    %50 = vector.broadcast %cst_13 : f32 to vector<4x256xf32>
    %51 = arith.select %49, %50, %47 : vector<4x256xi1>, vector<4x256xf32>
    %52 = vector.extract_strided_slice %24 {offsets = [0, 33], sizes = [4, 256], strides = [1, 1]} : vector<4x384xf32> to vector<4x256xf32>
    %53 = vector.extract_strided_slice %24 {offsets = [0, 34], sizes = [4, 256], strides = [1, 1]} : vector<4x384xf32> to vector<4x256xf32>
    %cst_14 = arith.constant 0.000000e+00 : f32
    %54 = vector.shape_cast %22 : vector<1x256xi1> to vector<1x256xi1>
    %55 = vector.broadcast %54 : vector<1x256xi1> to vector<4x256xi1>
    %56 = vector.broadcast %cst_14 : f32 to vector<4x256xf32>
    %57 = arith.select %55, %56, %53 : vector<4x256xi1>, vector<4x256xf32>
    %58 = tpu.concatenate %29, %30, %35, %40, %41, %46, %51, %52, %57 in 0 : vector<4x256xf32>, vector<4x256xf32>, vector<4x256xf32>, vector<4x256xf32>, vector<4x256xf32>, vector<4x256xf32>, vector<4x256xf32>, vector<4x256xf32>, vector<4x256xf32> -> vector<36x256xf32>
    %cst_15 = arith.constant dense<0.000000e+00> : vector<4x256xf32>
    %59 = tpu.matmul %0, %58, %cst_15 {dimension_numbers = #tpu.dot_dimension_numbers<[1], [0], [0], [1], [0, 0, 1, 1], [], []>} : vector<4x36xf32>, vector<36x256xf32>, vector<4x256xf32> -> vector<4x256xf32>
    %cst_16 = arith.constant 0.000000e+00 : f32
    %60 = vector.broadcast %cst_16 : f32 to vector<4x256xf32>
    %61 = arith.maximumf %59, %60 : vector<4x256xf32>
    %cst_17 = arith.constant dense<0.000000e+00> : vector<4x256xf32>
    %62 = tpu.matmul %1, %61, %cst_17 {dimension_numbers = #tpu.dot_dimension_numbers<[1], [0], [0], [1], [0, 0, 1, 1], [], []>} : vector<4x4xf32>, vector<4x256xf32>, vector<4x256xf32> -> vector<4x256xf32>
    %63 = arith.addf %41, %62 : vector<4x256xf32>
    %c0_18 = arith.constant 0 : index
    %c0_19 = arith.constant 0 : index
    %c0_20 = arith.constant 0 : index
    %64 = vector.load %arg4[%c0_18, %c0_19, %c0_20] : memref<2x4x256xf32, #tpu.memory_space<vmem>>, vector<1x4x256xf32>
    %65 = vector.shape_cast %64 : vector<1x4x256xf32> to vector<4x256xf32>
    %66 = vector.shape_cast %63 : vector<4x256xf32> to vector<1x4x256xf32>
    tpu.vector_store %arg4[%c0_18, %c0_19, %c0_20], %66 {strides = array<i32>} : memref<2x4x256xf32, #tpu.memory_space<vmem>>, vector<1x4x256xf32>,
    %c1 = arith.constant 1 : index
    %c0_21 = arith.constant 0 : index
    %c0_22 = arith.constant 0 : index
    %67 = vector.load %arg1[%c1, %c0_21, %c0_22] : memref<2x4x384xf32, #tpu.memory_space<vmem>>, vector<1x4x384xf32>
    %68 = vector.shape_cast %67 : vector<1x4x384xf32> to vector<4x384xf32>
    %69 = vector.extract_strided_slice %68 {offsets = [0, 0], sizes = [4, 256], strides = [1, 1]} : vector<4x384xf32> to vector<4x256xf32>
    %cst_23 = arith.constant 0.000000e+00 : f32
    %70 = vector.shape_cast %20 : vector<1x256xi1> to vector<1x256xi1>
    %71 = vector.broadcast %70 : vector<1x256xi1> to vector<4x256xi1>
    %72 = vector.broadcast %cst_23 : f32 to vector<4x256xf32>
    %73 = arith.select %71, %72, %69 : vector<4x256xi1>, vector<4x256xf32>
    %74 = vector.extract_strided_slice %68 {offsets = [0, 1], sizes = [4, 256], strides = [1, 1]} : vector<4x384xf32> to vector<4x256xf32>
    %75 = vector.extract_strided_slice %68 {offsets = [0, 2], sizes = [4, 256], strides = [1, 1]} : vector<4x384xf32> to vector<4x256xf32>
    %cst_24 = arith.constant 0.000000e+00 : f32
    %76 = vector.shape_cast %22 : vector<1x256xi1> to vector<1x256xi1>
    %77 = vector.broadcast %76 : vector<1x256xi1> to vector<4x256xi1>
    %78 = vector.broadcast %cst_24 : f32 to vector<4x256xf32>
    %79 = arith.select %77, %78, %75 : vector<4x256xi1>, vector<4x256xf32>
    %80 = vector.extract_strided_slice %68 {offsets = [0, 16], sizes = [4, 256], strides = [1, 1]} : vector<4x384xf32> to vector<4x256xf32>
    %cst_25 = arith.constant 0.000000e+00 : f32
    %81 = vector.shape_cast %20 : vector<1x256xi1> to vector<1x256xi1>
    %82 = vector.broadcast %81 : vector<1x256xi1> to vector<4x256xi1>
    %83 = vector.broadcast %cst_25 : f32 to vector<4x256xf32>
    %84 = arith.select %82, %83, %80 : vector<4x256xi1>, vector<4x256xf32>
    %85 = vector.extract_strided_slice %68 {offsets = [0, 17], sizes = [4, 256], strides = [1, 1]} : vector<4x384xf32> to vector<4x256xf32>
    %86 = vector.extract_strided_slice %68 {offsets = [0, 18], sizes = [4, 256], strides = [1, 1]} : vector<4x384xf32> to vector<4x256xf32>
    %cst_26 = arith.constant 0.000000e+00 : f32
    %87 = vector.shape_cast %22 : vector<1x256xi1> to vector<1x256xi1>
    %88 = vector.broadcast %87 : vector<1x256xi1> to vector<4x256xi1>
    %89 = vector.broadcast %cst_26 : f32 to vector<4x256xf32>
    %90 = arith.select %88, %89, %86 : vector<4x256xi1>, vector<4x256xf32>
    %91 = vector.extract_strided_slice %68 {offsets = [0, 32], sizes = [4, 256], strides = [1, 1]} : vector<4x384xf32> to vector<4x256xf32>
    %cst_27 = arith.constant 0.000000e+00 : f32
    %92 = vector.shape_cast %20 : vector<1x256xi1> to vector<1x256xi1>
    %93 = vector.broadcast %92 : vector<1x256xi1> to vector<4x256xi1>
    %94 = vector.broadcast %cst_27 : f32 to vector<4x256xf32>
    %95 = arith.select %93, %94, %91 : vector<4x256xi1>, vector<4x256xf32>
    %96 = vector.extract_strided_slice %68 {offsets = [0, 33], sizes = [4, 256], strides = [1, 1]} : vector<4x384xf32> to vector<4x256xf32>
    %97 = vector.extract_strided_slice %68 {offsets = [0, 34], sizes = [4, 256], strides = [1, 1]} : vector<4x384xf32> to vector<4x256xf32>
    %cst_28 = arith.constant 0.000000e+00 : f32
    %98 = vector.shape_cast %22 : vector<1x256xi1> to vector<1x256xi1>
    %99 = vector.broadcast %98 : vector<1x256xi1> to vector<4x256xi1>
    %100 = vector.broadcast %cst_28 : f32 to vector<4x256xf32>
    %101 = arith.select %99, %100, %97 : vector<4x256xi1>, vector<4x256xf32>
    %102 = tpu.concatenate %73, %74, %79, %84, %85, %90, %95, %96, %101 in 0 : vector<4x256xf32>, vector<4x256xf32>, vector<4x256xf32>, vector<4x256xf32>, vector<4x256xf32>, vector<4x256xf32>, vector<4x256xf32>, vector<4x256xf32>, vector<4x256xf32> -> vector<36x256xf32>
    %cst_29 = arith.constant dense<0.000000e+00> : vector<4x256xf32>
    %103 = tpu.matmul %0, %102, %cst_29 {dimension_numbers = #tpu.dot_dimension_numbers<[1], [0], [0], [1], [0, 0, 1, 1], [], []>} : vector<4x36xf32>, vector<36x256xf32>, vector<4x256xf32> -> vector<4x256xf32>
    %cst_30 = arith.constant 0.000000e+00 : f32
    %104 = vector.broadcast %cst_30 : f32 to vector<4x256xf32>
    %105 = arith.maximumf %103, %104 : vector<4x256xf32>
    %cst_31 = arith.constant dense<0.000000e+00> : vector<4x256xf32>
    %106 = tpu.matmul %1, %105, %cst_31 {dimension_numbers = #tpu.dot_dimension_numbers<[1], [0], [0], [1], [0, 0, 1, 1], [], []>} : vector<4x4xf32>, vector<4x256xf32>, vector<4x256xf32> -> vector<4x256xf32>
    %107 = arith.addf %85, %106 : vector<4x256xf32>
    %c1_32 = arith.constant 1 : index
    %c0_33 = arith.constant 0 : index
    %c0_34 = arith.constant 0 : index
    %108 = vector.load %arg4[%c1_32, %c0_33, %c0_34] : memref<2x4x256xf32, #tpu.memory_space<vmem>>, vector<1x4x256xf32>
    %109 = vector.shape_cast %108 : vector<1x4x256xf32> to vector<4x256xf32>
    %110 = vector.shape_cast %107 : vector<4x256xf32> to vector<1x4x256xf32>
    tpu.vector_store %arg4[%c1_32, %c0_33, %c0_34], %110 {strides = array<i32>} : memref<2x4x256xf32, #tpu.memory_space<vmem>>, vector<1x4x256xf32>,
    return
  }
  func.func @transform_0(%arg0: i32) -> (i32, i32, i32) {
    %c0_i32 = arith.constant 0 : i32
    %c0_i32_0 = arith.constant 0 : i32
    %c0_i32_1 = arith.constant 0 : i32
    %c0_i32_2 = arith.constant 0 : i32
    return %c0_i32, %c0_i32_0, %c0_i32_1 : i32, i32, i32
  }
  func.func @transform_1(%arg0: i32) -> (i32, i32) {
    %c0_i32 = arith.constant 0 : i32
    %c0_i32_0 = arith.constant 0 : i32
    %c0_i32_1 = arith.constant 0 : i32
    return %c0_i32, %c0_i32_0 : i32, i32
  }
  func.func @transform_2(%arg0: i32) -> (i32, i32) {
    %c0_i32 = arith.constant 0 : i32
    %c0_i32_0 = arith.constant 0 : i32
    %c0_i32_1 = arith.constant 0 : i32
    return %c0_i32, %c0_i32_0 : i32, i32
  }
  func.func @transform_3(%arg0: i32) -> (i32, i32, i32) {
    %c0_i32 = arith.constant 0 : i32
    %c0_i32_0 = arith.constant 0 : i32
    %c0_i32_1 = arith.constant 0 : i32
    %c0_i32_2 = arith.constant 0 : i32
    return %c0_i32, %c0_i32_0, %c0_i32_1 : i32, i32, i32
  }
}

</mosaic_0001>

<bundles_post_ra>
// kernel: tpu_custom_call.1
= control target key start
LH: loop header
LB: loop body
LE: loop exit
PB: predicated region body
PF: predicated region fallthrough
CT: control target
= control target key end

     0   :  { %8 = vsyncpa [#allocation3], 0  ;;  %s1215_s0 = inlined_call_operand.hbm [shape: f32[2,4,384], index: 0, kind: input, shape index: {}]   ;;  %s1216_s1 = inlined_call_operand.hbm [shape: f32[4,36], index: 1, kind: input, shape index: {}]   ;;  %s1217_s2 = inlined_call_operand.vmem [shape: f32[4,4], index: 2, kind: input, shape index: {}]   ;;  %s1218_s3 = inlined_call_operand.hbm [shape: f32[2,4,256], index: 3, kind: output, shape index: {}]  }
   0x1   :  { %9 = vsyncpa [#allocation6], 0 }
   0x2   :  { %10 = vsyncpa [#allocation4], 0  ;;  %s911_s12 = smov [#allocation2]   ;;  %s839_s16 = scalar_lea.hbm %s1215_s0, 384 }
   0x3   :  { %s16_s13 = sshll.u32 %s911_s12, 4  ;;  %p840_p0 = scmp.ne.s32.totalorder %s1215_s0, %s839_s16  ;;  %s17_s13 = int_to_ptr.vmem [resolvable:$true] %s16_s13 }
   0x4   :  { %p843_p1 = scmp.lt.u32.totalorder %s839_s16, %s1215_s0 }
   0x6   :  { %p845_p2 = pnand %p843_p1, %p840_p0 }
   0x8   :  { %848 = shalt.err (!%p845_p2)
}
   0x9   :  { %s849_s21 = scalar_lea.vmem %s17_s13, 384  ;;  %p854_p4 = scmp.lt.s32.totalorder %s17_s13, %s17_s13 }
   0xa   :  { %p850_p3 = scmp.ne.s32.totalorder %s17_s13, %s849_s21  ;;  %p855_p5 = scmp.lt.s32.totalorder %s849_s21, %s849_s21 }
   0xc   :  { %p856_p6 = por %p855_p5, %p854_p4 }
   0xe   :  { %p857_p7 = pnand %p856_p6, %p850_p3 }
  0x10   :  { %860 = shalt.err (!%p857_p7)
}
  0x11   :  { %s912_s22 = smov 192   ;;  %s913_s23 = smov 12  }
  0x12   :  { %22 = dma.hbm_to_vmem [thread:$0]  %s1215_s0, 384, %s17_s13, [#allocation3], %s912_s22, %s912_s22, %s913_s23  }
  0x13   :  { %s914_s26 = smov [#allocation5]   ;;  %s861_s30 = scalar_lea.hbm %s1216_s1, 64 }
  0x14   :  { %s29_s27 = sshll.u32 %s914_s26, 4  ;;  %p862_p8 = scmp.ne.s32.totalorder %s1216_s1, %s861_s30  ;;  %s30_s27 = int_to_ptr.vmem [resolvable:$true] %s29_s27 }
  0x15   :  { %p865_p9 = scmp.lt.u32.totalorder %s861_s30, %s1216_s1 }
  0x17   :  { %p867_p10 = pnand %p865_p9, %p862_p8 }
  0x19   :  { %870 = shalt.err (!%p867_p10)
}
  0x1a   :  { %s871_s8 = scalar_lea.vmem %s30_s27, 64  ;;  %p876_p12 = scmp.lt.s32.totalorder %s30_s27, %s30_s27 }
  0x1b   :  { %p872_p11 = scmp.ne.s32.totalorder %s30_s27, %s871_s8  ;;  %p877_p13 = scmp.lt.s32.totalorder %s871_s8, %s871_s8 }
  0x1d   :  { %p878_p0 = por %p877_p13, %p876_p12 }
  0x1f   :  { %p879_p1 = pnand %p878_p0, %p872_p11 }
  0x21   :  { %882 = shalt.err (!%p879_p1)
}
  0x22   :  { %32 = dma.hbm_to_vmem [thread:$0]  %s1216_s1, 64, %s30_s27, [#allocation6]  }
  0x23   :  { %905 = dma.done.wait [#allocation3], 384  }
  0x24   :  { %906 = vsyncadd [#allocation3], 4294966912 }
  0x25   :  { %907 = dma.done.wait [#allocation6], 64  }
  0x26   :  { %908 = vsyncadd [#allocation6], 4294967232  ;;  %v972_v0 = vld [vmem:[#allocation2] sm:$0xff]  ;;  %v974_v1 = vld [vmem:[#allocation2 + $0x8] sm:$0xf]  ;;  %s915_s10 = smov 126   ;;  %v43_v15 = vlaneseq }
  0x27   :  { %90 = vrot.lane.b32.xlu1 %v972_v0, %s915_s10  ;;  %s916_s11 = smov 112   ;;  %v982_v2 = vcombine.high %v972_v0, %v972_v0  ;;  %v156_v3 = vcombine.low %v974_v1, %v974_v1  ;;  %s917_s1 = smov 110   ;;  %v155_v6 = vcombine.low %v972_v0, %v972_v0  ;;  %v922_v7 = vmov 0.0   ;;  %v1004_v8 = vld [vmem:[#allocation2 + $0xc] sm:$0xff]  ;;  %v1014_v10 = vld [vmem:[#allocation2 + $0x14] sm:$0xf] }
  0x28   :  { %103 = vrot.lane.b32.xlu0 %v972_v0, %s916_s11  ;;  %s918_s12 = smov 127   ;;  %s919_s13 = smov 96   ;;  %285 = vmatprep.mubr.f32.mxu0 %v922_v7  ;;  %v1012_v9 = vcombine.high %v1004_v8, %v1004_v8  ;;  %v469_v12 = vcombine.low %v1014_v10, %v1014_v10  ;;  %v468_v14 = vcombine.low %v1004_v8, %v1004_v8  ;;  %v44_v16 = vand.u32 127, %v43_v15 }
  0x29   :  { %v768_v4 = vpack.i.bf16 %v974_v1, %v982_v2  ;;  %v773_v5 = vpack.i.bf16 %v156_v3, %v972_v0  ;;  %s920_s14 = smov 95   ;;  %s921_s15 = smov 111   ;;  %368 = vmatprep.mubr.f32.mxu1 %v922_v7  ;;  %vm109_vm0 = vcmask 916480   ;;  %vm96_vm4 = vcmask 1031168  }
  0x2a   :  { %s923_s16 = smov 94   ;;  %v798_v11 = vpack.i.bf16 %v1014_v10, %v1012_v9  ;;  %v808_v13 = vpack.i.bf16 %v469_v12, %v1004_v8  ;;  %v45_v17 = vadd.s32 128, %v44_v16  ;;  %v50_v20 = vand.u32 15, %v44_v16  ;;  %s925_s19 = smov [#allocation7]  }
  0x2b   :  { %769 = vrot.lane.b32.xlu1 %v768_v4, %s915_s10  ;;  %vm163_vm5 = vcmask 1039360   ;;  %vm202_vm6 = vcmask 1043456   ;;  %vm122_vm8 = vcmask 900096   ;;  %vm135_vm9 = vcmask 785408   ;;  %s705_s20 = sshll.u32 %s925_s19, 4  ;;  %s706_s20 = int_to_ptr.vmem [resolvable:$true] %s705_s20 }
  0x2c   :  { %764 = vrot.lane.b32.xlu0 %v768_v4, %s916_s11  ;;  %v57_v21 = vand.u32 15, %v45_v17  ;;  %vm1052_vm2 = vcmp.eq.s32.totalorder %v50_v20, 0  ;;  %vm1072_vm7 = vcmp.eq.s32.totalorder %v50_v20, 15  ;;  %vm180_vm10 = vcmask 908288   ;;  %s883_s21 = scalar_lea.vmem %s706_s20, 256  ;;  %p888_p3 = scmp.lt.s32.totalorder %s706_s20, %s706_s20 }
  0x2d   :  { %v83_v47 = vsel %vm1052_vm2, 0.0, %v972_v0  ;;  %vm197_vm11 = vcmask 777216   ;;  %vm148_vm12 = vcmask 769024   ;;  %vm211_vm13 = vcmask 293888   ;;  %p884_p2 = scmp.ne.s32.totalorder %s706_s20, %s883_s21  ;;  %p889_p4 = scmp.lt.s32.totalorder %s883_s21, %s883_s21 }
  0x2e   :  { %vm1048_vm1 = vcmp.eq.s32.totalorder %v57_v21, 0  ;;  %vm1056_vm3 = vcmp.eq.s32.totalorder %v57_v21, 15  ;;  %vm294_vm14 = vcmask 31744   ;;  %vm381_vm15 = vcmask 138240  }
  0x2f   :  { %779 = vrot.lane.b32.xlu1 %v768_v4, %s917_s1  ;;  %v84_v40 = vsel %vm1048_vm1, 0.0, %v982_v2  ;;  %p890_p5 = por %p889_p4, %p888_p3 }
  0x30   :  { %774 = vrot.lane.b32.xlu0 %v773_v5, %s918_s12 }
  0x31   :  { %p891_p6 = pnand %p890_p5, %p884_p2 }
  0x33   :  { %116 = vrot.lane.b32.xlu1 %v972_v0, %s917_s1 }
  0x34   :  { %157 = vrot.lane.b32.xlu0 %v155_v6, %s918_s12 }
  0x37   :  { %129 = vrot.lane.b32.xlu1 %v972_v0, %s919_s13 }
  0x38   :  { %784 = vrot.lane.b32.xlu0 %v768_v4, %s919_s13 }
  0x3b   :  { %794 = vrot.lane.b32.xlu1 %v773_v5, %s920_s14 }
  0x3c   :  { %789 = vrot.lane.b32.xlu0 %v768_v4, %s921_s15 }
  0x3f   :  { %191 = vrot.lane.b32.xlu1 %v155_v6, %s920_s14 }
  0x40   :  { %174 = vrot.lane.b32.xlu0 %v972_v0, %s921_s15 }
  0x43   :  { %146 = vrot.lane.b32.xlu1 %v974_v1, %s923_s16 }
  0x44   :  { %144 = vrot.lane.b32.xlu0 %v982_v2, %s923_s16 }
  0x47   :  { %799 = vrot.lane.b32.xlu1 %v798_v11, %s916_s11 }
  0x48   :  { %142 = vrot.lane.b32.xlu0 %v972_v0, %s923_s16 }
  0x4b   :  { %804 = vrot.lane.b32.xlu1 %v798_v11, %s915_s10 }
  0x4c   :  { %420 = vrot.lane.b32.xlu0 %v1004_v8, %s916_s11 }
  0x4f   :  { %809 = vrot.lane.b32.xlu1 %v808_v13, %s918_s12 }
  0x50   :  { %408 = vrot.lane.b32.xlu0 %v1004_v8, %s915_s10 }
  0x53   :  { %470 = vrot.lane.b32.xlu1 %v468_v14, %s918_s12 }
  0x54   :  { %814 = vrot.lane.b32.xlu0 %v798_v11, %s917_s1 }
  0x57   :  { %819 = vrot.lane.b32.xlu1 %v798_v11, %s919_s13 }
  0x58   :  { %432 = vrot.lane.b32.xlu0 %v1004_v8, %s917_s1 }
  0x5b   :  { %824 = vrot.lane.b32.xlu1 %v798_v11, %s921_s15 }
  0x5c   :  { %444 = vrot.lane.b32.xlu0 %v1004_v8, %s919_s13 }
  0x5f   :  { %486 = vrot.lane.b32.xlu1 %v1004_v8, %s921_s15 }
  0x60   :  { %829 = vrot.lane.b32.xlu0 %v808_v13, %s920_s14 }
  0x63   :  { %458 = vrot.lane.b32.xlu1 %v1012_v9, %s923_s16 }
  0x64   :  { %502 = vrot.lane.b32.xlu0 %v468_v14, %s920_s14 }
  0x67   :  { %456 = vrot.lane.b32.xlu1 %v1004_v8, %s923_s16 }
  0x68   :  { %460 = vrot.lane.b32.xlu0 %v1014_v10, %s923_s16 }
  0x99   :  { %v91_v18 = vpop.permute.xlu1 %90 }
  0x9a   :  { %v104_v19 = vpop.permute.xlu0 %103 }
  0x9d   :  { %v770_v22 = vpop.permute.xlu1 %769 }
  0x9e   :  { %v765_v23 = vpop.permute.xlu0 %764  ;;  %v772_v26 = vunpack.i.h.bf16 %v770_v22  ;;  %v771_v27 = vunpack.i.l.bf16 %v770_v22 }
  0x9f   :  { %v767_v28 = vunpack.i.h.bf16 %v765_v23  ;;  %v766_v29 = vunpack.i.l.bf16 %v765_v23 }
  0xa0   :  { %v98_v33 = vsel %vm96_vm4, %v771_v27, %v772_v26  ;;  %v97_v44 = vsel %vm96_vm4, %v91_v18, %v771_v27 }
  0xa1   :  { %v110_v31 = vsel %vm109_vm0, %v104_v19, %v766_v29  ;;  %v111_v32 = vsel %vm109_vm0, %v766_v29, %v767_v28  ;;  %v780_v34 = vpop.permute.xlu1 %779  ;;  %v102_v41 = vsel %vm1056_vm3, 0.0, %v98_v33  ;;  %v101_v56 = vsel %vm1072_vm7, 0.0, %v97_v44 }
  0xa2   :  { %v775_v35 = vpop.permute.xlu0 %774  ;;  %v115_v36 = vsel %vm1048_vm1, 0.0, %v111_v32  ;;  %v114_v37 = vsel %vm1052_vm2, 0.0, %v110_v31  ;;  %v782_v48 = vunpack.i.h.bf16 %v780_v34  ;;  %v781_v49 = vunpack.i.l.bf16 %v780_v34 }
  0xa3   :  { %v777_v38 = vunpack.i.h.bf16 %v775_v35  ;;  %v776_v39 = vunpack.i.l.bf16 %v775_v35  ;;  %v171_v43 = vrot.slane %v115_v36, 4  ;;  %v170_v45 = vrot.slane %v114_v37, 4 }
  0xa4   :  { %v124_v60 = vsel %vm122_vm8, %v781_v49, %v782_v48 }
  0xa5   :  { %v165_v46 = vsel %vm163_vm5, %v776_v39, %v777_v38  ;;  %v117_v50 = vpop.permute.xlu1 %116  ;;  %v206_v53 = vsel %vm202_vm6, %v102_v41, %v171_v43  ;;  %v205_v58 = vsel %vm202_vm6, %v101_v56, %v170_v45  ;;  %v128_v4 = vsel %vm1056_vm3, 0.0, %v124_v60  ;;  %v1113_v45 = vld [vmem:[#allocation5] sm:$0xf] }
  0xa6   :  { %v158_v51 = vpop.permute.xlu0 %157  ;;  %v204_v52 = vsel %vm202_vm6, %v84_v40, %v165_v46  ;;  %v123_v63 = vsel %vm122_vm8, %v117_v50, %v781_v49  ;;  %v188_v18 = vrot.slane %v128_v4, 4  ;;  %v405_v60 = vsel %vm1052_vm2, 0.0, %v1004_v8 }
  0xa7   :  { %v164_v54 = vsel %vm163_vm5, %v158_v51, %v776_v39  ;;  %v730_v55 = vpack.c.bf16 %v206_v53, %v204_v52  ;;  %v127_v5 = vsel %vm1072_vm7, 0.0, %v123_v63 }
  0xa8   :  { %v203_v57 = vsel %vm202_vm6, %v83_v47, %v164_v54  ;;  %v187_v22 = vrot.slane %v127_v5, 4 }
  0xa9   :  { %731 = vmatprep.subr.bf16.mxu0 %v730_v55  ;;  %v732_v59 = vpack.c.bf16 %v205_v58, %v203_v57  ;;  %v130_v61 = vpop.permute.xlu1 %129 }
  0xaa   :  { %v785_v62 = vpop.permute.xlu0 %784 }
  0xab   :  { %v787_v2 = vunpack.i.h.bf16 %v785_v62  ;;  %v786_v3 = vunpack.i.l.bf16 %v785_v62  ;;  %733 = vmatpush1.bf16.msra.mxu0 %v732_v59 }
  0xad   :  { %v137_v6 = vsel %vm135_vm9, %v786_v3, %v787_v2  ;;  %v795_v11 = vpop.permute.xlu1 %794  ;;  %v136_v17 = vsel %vm135_vm9, %v130_v61, %v786_v3 }
  0xae   :  { %v790_v12 = vpop.permute.xlu0 %789  ;;  %v797_v13 = vunpack.i.h.bf16 %v795_v11  ;;  %v796_v14 = vunpack.i.l.bf16 %v795_v11  ;;  %v141_v20 = vsel %vm1048_vm1, 0.0, %v137_v6  ;;  %v140_v29 = vsel %vm1052_vm2, 0.0, %v136_v17 }
  0xaf   :  { %v792_v15 = vunpack.i.h.bf16 %v790_v12  ;;  %v791_v16 = vunpack.i.l.bf16 %v790_v12 }
  0xb0   :  { %v199_v21 = vsel %vm197_vm11, %v796_v14, %v797_v13 }
  0xb1   :  { %v182_v19 = vsel %vm180_vm10, %v791_v16, %v792_v15  ;;  %v192_v23 = vpop.permute.xlu1 %191  ;;  %v210_v28 = vsel %vm202_vm6, %v141_v20, %v199_v21 }
  0xb2   :  { %v175_v26 = vpop.permute.xlu0 %174  ;;  %v208_v27 = vsel %vm202_vm6, %v182_v19, %v188_v18  ;;  %v198_v31 = vsel %vm197_vm11, %v192_v23, %v796_v14 }
  0xb3   :  { %v181_v32 = vsel %vm180_vm10, %v175_v26, %v791_v16  ;;  %v734_v33 = vpack.c.bf16 %v210_v28, %v208_v27  ;;  %v209_v34 = vsel %vm202_vm6, %v140_v29, %v198_v31 }
  0xb4   :  { %v207_v35 = vsel %vm202_vm6, %v181_v32, %v187_v22 }
  0xb5   :  { %735 = vmatprep.subr.bf16.mxu0 %v734_v33  ;;  %v736_v36 = vpack.c.bf16 %v209_v34, %v207_v35  ;;  %v147_v37 = vpop.permute.xlu1 %146 }
  0xb6   :  { %v145_v38 = vpop.permute.xlu0 %144 }
  0xb7   :  { %v150_v39 = vsel %vm148_vm12, %v145_v38, %v147_v37  ;;  %737 = vmatpush1.bf16.msra.mxu0 %v736_v36 }
  0xb8   :  { %v154_v40 = vsel %vm1056_vm3, 0.0, %v150_v39 }
  0xb9   :  { %718 = vmatprep.subr.msk.mxu0 %vm202_vm6, %v154_v40  ;;  %v800_v43 = vpop.permute.xlu1 %799  ;;  %v406_v40 = vsel %vm1048_vm1, 0.0, %v1012_v9 }
  0xba   :  { %v143_v41 = vpop.permute.xlu0 %142  ;;  %v801_v46 = vunpack.i.l.bf16 %v800_v43  ;;  %v802_v32 = vunpack.i.h.bf16 %v800_v43 }
  0xbb   :  { %v149_v44 = vsel %vm148_vm12, %v143_v41, %v145_v38 }
  0xbc   :  { %v153_v47 = vsel %vm1072_vm7, 0.0, %v149_v44  ;;  %v427_v33 = vsel %vm109_vm0, %v801_v46, %v802_v32 }
  0xbd   :  { %719 = vmatpush1.msk.msra.mxu0 %vm202_vm6, %v153_v47  ;;  %v805_v49 = vpop.permute.xlu1 %804  ;;  %v431_v35 = vsel %vm1048_vm1, 0.0, %v427_v33 }
  0xbe   :  { %720 = vmatmul.mubr.msk.f32.vlgmr.msra.gmra.mrb[0].mxu0 %vm211_vm13, %v1113_v45  ;;  %v421_v48 = vpop.permute.xlu0 %420  ;;  %v806_v51 = vunpack.i.l.bf16 %v805_v49  ;;  %v807_v34 = vunpack.i.h.bf16 %v805_v49  ;;  %v483_v37 = vrot.slane %v431_v35, 4 }
  0xbf   :  { %v426_v50 = vsel %vm109_vm0, %v421_v48, %v801_v46  ;;  %669 = vmatprep.mubr.f32.mxu0 %v922_v7 }
  0xc0   :  { %v430_v52 = vsel %vm1052_vm2, 0.0, %v426_v50  ;;  %v415_v25 = vsel %vm96_vm4, %v806_v51, %v807_v34 }
  0xc1   :  { %v482_v53 = vrot.slane %v430_v52, 4  ;;  %v810_v55 = vpop.permute.xlu1 %809  ;;  %v419_v41 = vsel %vm1056_vm3, 0.0, %v415_v25 }
  0xc2   :  { %v409_v54 = vpop.permute.xlu0 %408  ;;  %v811_v57 = vunpack.i.l.bf16 %v810_v55  ;;  %v812_v36 = vunpack.i.h.bf16 %v810_v55  ;;  %v515_v46 = vsel %vm202_vm6, %v419_v41, %v483_v37 }
  0xc3   :  { %v414_v56 = vsel %vm96_vm4, %v409_v54, %v806_v51 }
  0xc4   :  { %v418_v58 = vsel %vm1072_vm7, 0.0, %v414_v56  ;;  %v477_v39 = vsel %vm163_vm5, %v811_v57, %v812_v36 }
  0xc5   :  { %v1128_v59 = vsel %vm202_vm6, %v418_v58, %v482_v53  ;;  %v471_v62 = vpop.permute.xlu1 %470  ;;  %v513_v44 = vsel %vm202_vm6, %v406_v40, %v477_v39 }
  0xc6   :  { %v815_v61 = vpop.permute.xlu0 %814  ;;  %v476_v63 = vsel %vm163_vm5, %v471_v62, %v811_v57  ;;  %v738_v47 = vpack.c.bf16 %v515_v46, %v513_v44 }
  0xc7   :  { %v816_v2 = vunpack.i.l.bf16 %v815_v61  ;;  %v1135_v3 = vsel %vm202_vm6, %v405_v60, %v476_v63  ;;  %v817_v38 = vunpack.i.h.bf16 %v815_v61 }
  0xc8   :  { %v740_v4 = vpack.c.bf16 %v1128_v59, %v1135_v3 }
  0xc9   :  { %v820_v6 = vpop.permute.xlu1 %819  ;;  %v439_v43 = vsel %vm122_vm8, %v816_v2, %v817_v38 }
  0xca   :  { %v433_v5 = vpop.permute.xlu0 %432  ;;  %v821_v12 = vunpack.i.l.bf16 %v820_v6  ;;  %v822_v48 = vunpack.i.h.bf16 %v820_v6  ;;  %v443_v49 = vsel %vm1056_vm3, 0.0, %v439_v43 }
  0xcb   :  { %v438_v11 = vsel %vm122_vm8, %v433_v5, %v816_v2  ;;  %v499_v52 = vrot.slane %v443_v49, 4  ;;  %v42_v2 = vld [vmem:[%s1217_s2] sm:$0xf]  ;;  %s924_s2 = smov 17  }
  0xcc   :  { %v442_v15 = vsel %vm1072_vm7, 0.0, %v438_v11  ;;  %v451_v53 = vsel %vm135_vm9, %v821_v12, %v822_v48 }
  0xcd   :  { %v825_v14 = vpop.permute.xlu1 %824  ;;  %v498_v17 = vrot.slane %v442_v15, 4  ;;  %v455_v55 = vsel %vm1048_vm1, 0.0, %v451_v53 }
  0xce   :  { %v445_v13 = vpop.permute.xlu0 %444  ;;  %v826_v16 = vunpack.i.l.bf16 %v825_v14  ;;  %v827_v50 = vunpack.i.h.bf16 %v825_v14 }
  0xcf   :  { %v450_v18 = vsel %vm135_vm9, %v445_v13, %v821_v12 }
  0xd0   :  { %v454_v23 = vsel %vm1052_vm2, 0.0, %v450_v18  ;;  %v493_v9 = vsel %vm180_vm10, %v826_v16, %v827_v50 }
  0xd1   :  { %v487_v20 = vpop.permute.xlu1 %486  ;;  %v517_v56 = vsel %vm202_vm6, %v493_v9, %v499_v52 }
  0xd2   :  { %v830_v19 = vpop.permute.xlu0 %829  ;;  %v492_v22 = vsel %vm180_vm10, %v487_v20, %v826_v16 }
  0xd3   :  { %v831_v21 = vunpack.i.l.bf16 %v830_v19  ;;  %v516_v26 = vsel %vm202_vm6, %v492_v22, %v498_v17  ;;  %v832_v51 = vunpack.i.h.bf16 %v830_v19 }
  0xd5   :  { %v509_v54 = vsel %vm197_vm11, %v831_v21, %v832_v51  ;;  %v459_v62 = vpop.permute.xlu1 %458 }
  0xd6   :  { %v503_v27 = vpop.permute.xlu0 %502  ;;  %v519_v57 = vsel %vm202_vm6, %v455_v55, %v509_v54 }
  0xd7   :  { %v508_v28 = vsel %vm197_vm11, %v503_v27, %v831_v21  ;;  %v742_v58 = vpack.c.bf16 %v519_v57, %v517_v56 }
  0xd8   :  { %v518_v29 = vsel %vm202_vm6, %v454_v23, %v508_v28 }
  0xd9   :  { %v744_v31 = vpack.c.bf16 %v518_v29, %v516_v26  ;;  %v457_v5 = vpop.permute.xlu1 %456 }
  0xda   :  { %v461_v3 = vpop.permute.xlu0 %460  ;;  %v462_v11 = vsel %vm148_vm12, %v457_v5, %v459_v62 }
  0xdb   :  { %v463_v24 = vsel %vm148_vm12, %v459_v62, %v461_v3  ;;  %v466_v12 = vsel %vm1072_vm7, 0.0, %v462_v11 }
  0xdc   :  { %v467_v6 = vsel %vm1056_vm3, 0.0, %v463_v24 }
 0x191   :  { %v287_v59 = vpop.f32.mrb[0].mxu0 }
 0x192   :  { %v289_v60 = vpop.f32.mrb[1].mxu0  ;;  %v292_v63 = vmax.f32 %v287_v59, 0.0 }
 0x193   :  { %v293_v61 = vmax.f32 %v289_v60, 0.0 }
 0x195   :  { %721 = vmatprep.subr.msk.mxu1 %vm202_vm6, %v293_v61 }
 0x196   :  { %722 = vmatpush1.msk.msra.mxu1 %vm202_vm6, %v292_v63 }
 0x197   :  { %723 = vmatmul.mubr.msk.f32.vlgmr.msra.gmra.mrb[0].mxu1 %vm294_vm14, %v42_v2  ;;  %739 = vmatprep.subr.bf16.mxu1 %v738_v47 }
 0x198   :  { %741 = vmatpush1.bf16.msra.mxu1 %v740_v4  ;;  %590 = vmatprep.mubr.f32.mxu1 %v922_v7 }
 0x199   :  { %743 = vmatprep.subr.bf16.mxu1 %v742_v58 }
 0x19c   :  { %745 = vmatpush1.bf16.msra.mxu1 %v744_v31 }
 0x19d   :  { %724 = vmatprep.subr.msk.mxu1 %vm202_vm6, %v467_v6 }
 0x1a0   :  { %725 = vmatpush1.msk.msra.mxu1 %vm202_vm6, %v466_v12 }
 0x1a1   :  { %726 = vmatmul.mubr.msk.f32.vlgmr.msra.gmra.mrb[2].mxu1 %vm211_vm13, %v1113_v45 }
 0x26a   :  { %v370_v4 = vpop.f32.mrb[0].mxu1 }
 0x26b   :  { %v372_v7 = vpop.f32.mrb[1].mxu1 }
 0x26c   :  { %v377_v13 = vcombine.low %v370_v4, %v372_v7 }
 0x26e   :  { %378 = vrot.lane.b32.xlu0 %v377_v13, %s924_s2 }
 0x274   :  { %v592_v30 = vpop.f32.mrb[2].mxu1 }
 0x275   :  { %v594_v14 = vpop.f32.mrb[3].mxu1  ;;  %v597_v16 = vmax.f32 %v592_v30, 0.0 }
 0x276   :  { %v598_v15 = vmax.f32 %v594_v14, 0.0 }
 0x278   :  { %727 = vmatprep.subr.msk.mxu0 %vm202_vm6, %v598_v15 }
 0x279   :  { %728 = vmatpush1.msk.msra.mxu0 %vm202_vm6, %v597_v16 }
 0x27a   :  { %729 = vmatmul.mubr.msk.f32.vlgmr.msra.gmra.mrb[2].mxu0 %vm294_vm14, %v42_v2 }
 0x2e0   :  { %v379_v42 = vpop.permute.xlu0 %378 }
 0x2e1   :  { %v380_v17 = vrot.slane %v379_v42, 4 }
 0x2e3   :  { %v382_v18 = vsel %vm381_vm15, %v380_v17, %v379_v42  ;;  %v386_v22 = vadd.f32 %v380_v17, %v974_v1 }
 0x2e4   :  { %v385_v45 = vadd.f32 %v382_v18, %v972_v0 }
 0x2e6   :  { %389 = vrot.lane.b32.xlu0 %v385_v45, %s921_s15 }
 0x34d   :  { %v671_v19 = vpop.f32.mrb[2].mxu0 }
 0x34e   :  { %v673_v20 = vpop.f32.mrb[3].mxu0 }
 0x34f   :  { %v678_v21 = vcombine.low %v671_v19, %v673_v20 }
 0x351   :  { %679 = vrot.lane.b32.xlu1 %v678_v21, %s924_s2 }
 0x355   :  { %391 = vrot.lane.b32.xlu1 %v386_v22, %s921_s15 }
 0x358   :  { %v390_v27 = vpop.permute.xlu0 %389 }
 0x359   :  { %v393_v0 = vrot.slane %v390_v27, 4 }
 0x3c3   :  { %v680_v23 = vpop.permute.xlu1 %679 }
 0x3c4   :  { %v681_v26 = vrot.slane %v680_v23, 4 }
 0x3c6   :  { %v682_v28 = vsel %vm381_vm15, %v681_v26, %v680_v23  ;;  %v686_v29 = vadd.f32 %v681_v26, %v1014_v10 }
 0x3c7   :  { %v685_v31 = vadd.f32 %v682_v28, %v1004_v8  ;;  %v392_v32 = vpop.permute.xlu1 %391 }
 0x3c8   :  { %v394_v33 = vrot.slane %v392_v32, 4  ;;  %691 = vrot.lane.b32.xlu1 %v686_v29, %s921_s15 }
 0x3c9   :  { %689 = vrot.lane.b32.xlu0 %v685_v31, %s921_s15 }
 0x3ca   :  { %v395_v34 = vsel %vm202_vm6, %v393_v0, %v394_v33 }
 0x3cb   :  { %v396_v1 = vsel %vm180_vm10, %v390_v27, %v395_v34 }
 0x3cc   :  { %398 = vst [vmem:[#allocation7] sm:$0xff] %v396_v1 }
 0x43a   :  { %v692_v35 = vpop.permute.xlu1 %691 }
 0x43b   :  { %v694_v36 = vrot.slane %v692_v35, 4  ;;  %v690_v37 = vpop.permute.xlu0 %689 }
 0x43c   :  { %v693_v10 = vrot.slane %v690_v37, 4 }
 0x43e   :  { %v695_v8 = vsel %vm202_vm6, %v693_v10, %v694_v36 }
 0x43f   :  { %v696_v25 = vsel %vm180_vm10, %v690_v37, %v695_v8 }
 0x440   :  { %699 = vst [vmem:[#allocation7 + $0x8] sm:$0xff] %v696_v25 }
 0x441   :  { %894 = shalt.err (!%p891_p6)
}
 0x442   :  { %s895_s24 = scalar_lea.hbm %s1218_s3, 256 }
 0x443   :  { %p896_p7 = scmp.ne.s32.totalorder %s1218_s3, %s895_s24  ;;  %p899_p8 = scmp.lt.u32.totalorder %s895_s24, %s1218_s3 }
 0x445   :  { %p901_p9 = pnand %p899_p8, %p896_p7 }
 0x447   :  { %904 = shalt.err (!%p901_p9)
}
 0x448   :  { %s926_s29 = smov 128   ;;  %s927_s30 = smov 8  }
 0x449   :  { %711 = dma.vmem_to_hbm [thread:$0]  %s706_s20, 256, %s1218_s3, [#allocation4], %s926_s29, %s926_s29, %s927_s30  }
 0x44a   :  { %909 = dma.done.wait [#allocation4], 256  }
 0x44b   :  { %910 = vsyncadd [#allocation4], 4294967040 }
 0x44c   :  { %715 = vsyncpa [#allocation3], 1 }
 0x44d   :  { %716 = vsyncpa [#allocation6], 1 }
 0x44e   :  { %717 = vsyncpa [#allocation4], 1 }

</bundles_post_ra>
